<compile_context>
chip_gen: v7x
topology: tpu7x:2x2x1
jax: 0.10.0
libtpu: 0.0.40
codegen_flags: <defaults>
</compile_context>

<pallas_src>
import jax
import jax.numpy as jnp
from jax.experimental import pallas as pl
from jax.experimental.pallas import tpu as pltpu


def _gnn_layer_kernel(h0_ref, g_ref, s_ref, eemb_ref,
                      w1_ref, b1_ref, w2_ref, b2_ref,
                      gamma_ref, beta_ref, out_ref):
    l = pl.program_id(0)
    last = pl.num_programs(0) - 1

    # Layer 0: seed the VMEM-resident output block with the input embedding.
    @pl.when(l == 0)
    def _():
        out_ref[...] = h0_ref[...]

    h = out_ref[...]                                                    # [N, Dp]

    # One-hot matrices stored bf16 (half the DMA bytes); upcast -> exact 0/1 f32.
    g = g_ref[...].astype(jnp.float32)                                  # [Ep, N]
    s = s_ref[...].astype(jnp.float32)                                  # [N, Ep]

    # message = x_src + edge_emb  (gather via one-hot G)
    msg = jnp.dot(g, h, preferred_element_type=jnp.float32) + eemb_ref[...]   # [Ep, Dp]
    # 'add' aggregation at dst via one-hot S
    agg = jnp.dot(s, msg, preferred_element_type=jnp.float32)                 # [N, Dp]

    # GIN MLP: Linear(D, 2D) -> ReLU -> Linear(2D, D)   (lane-padded dims)
    hid = jnp.dot(agg, w1_ref[...], preferred_element_type=jnp.float32) + b1_ref[...]
    hid = jnp.maximum(hid, 0.0)
    out = jnp.dot(hid, w2_ref[...], preferred_element_type=jnp.float32) + b2_ref[...]

    # BatchNorm1d, training-mode batch statistics (biased var), eps = 1e-5.
    # Fused single pass: var = E[x^2] - mean^2 (one fewer full-tile pass / XLU sweep).
    n_inv = 1.0 / out.shape[0]
    mean = jnp.sum(out, axis=0, keepdims=True) * n_inv
    msq = jnp.sum(out * out, axis=0, keepdims=True) * n_inv
    var = jnp.maximum(msq - mean * mean, 0.0)
    out = (out - mean) * jax.lax.rsqrt(var + 1e-5) * gamma_ref[...] + beta_ref[...]

    # ReLU on all but the last layer (dropout p=0 is identity) -- branch, don't select.
    @pl.when(l != last)
    def _():
        out_ref[...] = jnp.maximum(out, 0.0)

    @pl.when(l == last)
    def _():
        out_ref[...] = out


def _round_up(x, m):
    return (x + m - 1) // m * m


def _pad_axis(a, axis, target):
    pad = target - a.shape[axis]
    if pad == 0:
        return a
    widths = [(0, 0)] * a.ndim
    widths[axis] = (0, pad)
    return jnp.pad(a, widths)


def gnn_forward(h0, G, S, edge_emb, w1, b1, w2, b2, gamma, beta, *, lane=128):
    """All GNN layers in one pallas_call; grid axis = layer index.

    Pads feature / edge dims to lane width, ships one-hot matrices as bf16,
    runs the layer-looped kernel, slices back to the logical emb_dim.
    """
    N, D = h0.shape
    E = G.shape[0]
    L, _, H = w1.shape                 # [L, D, 2D]

    Dp = _round_up(D, lane)
    Hp = _round_up(H, lane)
    Ep = _round_up(E, lane)

    h0p = _pad_axis(h0, 1, Dp)                                   # [N, Dp]
    Gp = _pad_axis(G, 0, Ep).astype(jnp.bfloat16)                # [Ep, N]  (0/1 exact)
    Sp = _pad_axis(S, 1, Ep).astype(jnp.bfloat16)                # [N, Ep]
    eep = _pad_axis(_pad_axis(edge_emb, 1, Ep), 2, Dp)           # [L, Ep, Dp]
    w1p = _pad_axis(_pad_axis(w1, 1, Dp), 2, Hp)                 # [L, Dp, Hp]
    b1p = _pad_axis(b1, 2, Hp)                                   # [L, 1, Hp]
    w2p = _pad_axis(_pad_axis(w2, 1, Hp), 2, Dp)                 # [L, Hp, Dp]
    b2p = _pad_axis(b2, 2, Dp)                                   # [L, 1, Dp]
    gp = _pad_axis(gamma, 2, Dp)                                 # [L, 1, Dp]
    bp = _pad_axis(beta, 2, Dp)                                  # [L, 1, Dp]

    out = pl.pallas_call(
        _gnn_layer_kernel,
        out_shape=jax.ShapeDtypeStruct((N, Dp), jnp.float32),
        grid_spec=pltpu.PrefetchScalarGridSpec(
            num_scalar_prefetch=0,
            grid=(L,),
            in_specs=[
                pl.BlockSpec((N, Dp), lambda l: (0, 0)),          # h0 (padded)
                pl.BlockSpec((Ep, N), lambda l: (0, 0)),          # gather one-hot (src), bf16
                pl.BlockSpec((N, Ep), lambda l: (0, 0)),          # scatter one-hot (dst), bf16
                pl.BlockSpec((None, Ep, Dp), lambda l: (l, 0, 0)),  # per-layer edge embeddings
                pl.BlockSpec((None, Dp, Hp), lambda l: (l, 0, 0)),  # W1
                pl.BlockSpec((None, 1, Hp), lambda l: (l, 0, 0)),   # b1
                pl.BlockSpec((None, Hp, Dp), lambda l: (l, 0, 0)),  # W2
                pl.BlockSpec((None, 1, Dp), lambda l: (l, 0, 0)),   # b2
                pl.BlockSpec((None, 1, Dp), lambda l: (l, 0, 0)),   # BN gamma
                pl.BlockSpec((None, 1, Dp), lambda l: (l, 0, 0)),   # BN beta
            ],
            # Constant block index across the layer axis -> output stays VMEM
            # resident and doubles as the carried node state (no scratch).
            out_specs=pl.BlockSpec((N, Dp), lambda l: (0, 0)),
        ),
        compiler_params=pltpu.CompilerParams(dimension_semantics=("arbitrary",)),
    )(h0p, Gp, Sp, eep, w1p, b1p, w2p, b2p, gp, bp)

    return out[:, :D]


def ref_forward(h0, G, S, edge_emb, w1, b1, w2, b2, gamma, beta):
    """Pure-JAX reference of the same math (for correctness check)."""
    L = w1.shape[0]
    h = h0
    for l in range(L):
        msg = G @ h + edge_emb[l]
        agg = S @ msg
        hid = jnp.maximum(agg @ w1[l] + b1[l], 0.0)
        out = hid @ w2[l] + b2[l]
        mean = jnp.mean(out, axis=0, keepdims=True)
        var = jnp.mean((out - mean) ** 2, axis=0, keepdims=True)
        out = (out - mean) * jax.lax.rsqrt(var + 1e-5) * gamma[l] + beta[l]
        if l != L - 1:
            out = jnp.maximum(out, 0.0)
        h = out
    return h


if __name__ == "__main__":
    # --- config (small shapes) ---
    num_layer, emb_dim = 3, 32
    num_atom_type, num_chirality_tag = 120, 3
    num_bond_type, num_bond_direction = 6, 3
    N, num_edges = 16, 48

    key = jax.random.PRNGKey(0)
    keys = jax.random.split(key, 12 + num_layer)

    # --- synthetic graph inputs (like torch_geometric Data) ---
    x_atom = jax.random.randint(keys[0], (N,), 0, num_atom_type)
    x_chir = jax.random.randint(keys[1], (N,), 0, num_chirality_tag)
    src = jax.random.randint(keys[2], (num_edges,), 0, N)
    dst = jax.random.randint(keys[3], (num_edges,), 0, N)
    ea0 = jax.random.randint(keys[4], (num_edges,), 0, num_bond_type)
    ea1 = jax.random.randint(keys[5], (num_edges,), 0, num_bond_direction)

    # GINConv adds self loops with bond type 4 / direction 0
    src = jnp.concatenate([src, jnp.arange(N)])
    dst = jnp.concatenate([dst, jnp.arange(N)])
    ea0 = jnp.concatenate([ea0, jnp.full((N,), 4, jnp.int32)])
    ea1 = jnp.concatenate([ea1, jnp.zeros((N,), jnp.int32)])
    E = num_edges + N

    # --- deterministic parameter init ---
    def xavier(k, shape):
        bound = (6.0 / (shape[0] + shape[1])) ** 0.5
        return jax.random.uniform(k, shape, jnp.float32, -bound, bound)

    emb_atom = xavier(keys[6], (num_atom_type, emb_dim))
    emb_chir = xavier(keys[7], (num_chirality_tag, emb_dim))

    w1_l, b1_l, w2_l, b2_l, eemb_l = [], [], [], [], []
    for l in range(num_layer):
        k = jax.random.split(keys[8 + l], 6)
        w1_l.append(xavier(k[0], (emb_dim, 2 * emb_dim)))
        b1_l.append(jax.random.uniform(k[1], (1, 2 * emb_dim), jnp.float32, -0.1, 0.1))
        w2_l.append(xavier(k[2], (2 * emb_dim, emb_dim)))
        b2_l.append(jax.random.uniform(k[3], (1, emb_dim), jnp.float32, -0.1, 0.1))
        ee1 = xavier(k[4], (num_bond_type, emb_dim))
        ee2 = xavier(k[5], (num_bond_direction, emb_dim))
        eemb_l.append(ee1[ea0] + ee2[ea1])            # per-layer edge embeddings [E, D]

    w1 = jnp.stack(w1_l)                              # [L, D, 2D]
    b1 = jnp.stack(b1_l)                              # [L, 1, 2D]
    w2 = jnp.stack(w2_l)                              # [L, 2D, D]
    b2 = jnp.stack(b2_l)                              # [L, 1, D]
    edge_emb = jnp.stack(eemb_l)                      # [L, E, D]
    gamma = jnp.ones((num_layer, 1, emb_dim), jnp.float32)   # BN defaults
    beta = jnp.zeros((num_layer, 1, emb_dim), jnp.float32)

    # --- glue: embedding lookups and dense one-hot gather/scatter matrices ---
    h0 = emb_atom[x_atom] + emb_chir[x_chir]                                  # [N, D]
    G = (src[:, None] == jnp.arange(N)[None, :]).astype(jnp.float32)          # [E, N]
    S = (jnp.arange(N)[:, None] == dst[None, :]).astype(jnp.float32)          # [N, E]

    # --- run kernel ---
    out = gnn_forward(h0, G, S, edge_emb, w1, b1, w2, b2, gamma, beta)
    out = jax.block_until_ready(out)

    # --- correctness check against pure-JAX reference ---
    ref = ref_forward(h0, G, S, edge_emb, w1, b1, w2, b2, gamma, beta)
    assert out.shape == (N, emb_dim)
    assert jnp.allclose(out, ref, rtol=1e-4, atol=1e-4), (
        f"max abs err {jnp.max(jnp.abs(out - ref))}")

    print("KERNEL_OK")
</pallas_src>

<mosaic_0001>
module attributes {stable_mosaic.version = 11 : i64} {
  func.func @_gnn_layer_kernel(%arg0: i32, %arg1: memref<16x128xf32, #tpu.memory_space<vmem>>, %arg2: memref<128x16xbf16, #tpu.memory_space<vmem>>, %arg3: memref<16x128xbf16, #tpu.memory_space<vmem>>, %arg4: memref<1x128x128xf32, #tpu.memory_space<vmem>>, %arg5: memref<1x128x128xf32, #tpu.memory_space<vmem>>, %arg6: memref<1x1x128xf32, #tpu.memory_space<vmem>>, %arg7: memref<1x128x128xf32, #tpu.memory_space<vmem>>, %arg8: memref<1x1x128xf32, #tpu.memory_space<vmem>>, %arg9: memref<1x1x128xf32, #tpu.memory_space<vmem>>, %arg10: memref<1x1x128xf32, #tpu.memory_space<vmem>>, %arg11: memref<16x128xf32, #tpu.memory_space<vmem>>) attributes {dimension_semantics = [#tpu.dimension_semantics<arbitrary>], iteration_bounds = array<i64: 3>, scalar_prefetch = 0 : i64, scratch_operands = 0 : i64, tpu.core_type = #tpu.core_type<tc>, window_params = [{pipeline_mode = #tpu.pipeline_mode<synchronous>, transform_indices = @transform_0, window_bounds = array<i64: 16, 128>}, {pipeline_mode = #tpu.pipeline_mode<synchronous>, transform_indices = @transform_1, window_bounds = array<i64: 128, 16>}, {pipeline_mode = #tpu.pipeline_mode<synchronous>, transform_indices = @transform_2, window_bounds = array<i64: 16, 128>}, {transform_indices = @transform_3, window_bounds = array<i64: 1, 128, 128>}, {transform_indices = @transform_4, window_bounds = array<i64: 1, 128, 128>}, {transform_indices = @transform_5, window_bounds = array<i64: 1, 1, 128>}, {transform_indices = @transform_6, window_bounds = array<i64: 1, 128, 128>}, {transform_indices = @transform_7, window_bounds = array<i64: 1, 1, 128>}, {transform_indices = @transform_8, window_bounds = array<i64: 1, 1, 128>}, {transform_indices = @transform_9, window_bounds = array<i64: 1, 1, 128>}, {pipeline_mode = #tpu.pipeline_mode<synchronous>, transform_indices = @transform_10, window_bounds = array<i64: 16, 128>}]} {
    %c0_i32 = arith.constant 0 : i32
    %0 = arith.cmpi eq, %arg0, %c0_i32 : i32
    %1 = arith.extui %0 : i1 to i32
    %c0_i32_0 = arith.constant 0 : i32
    %2 = arith.cmpi ne, %1, %c0_i32_0 : i32
    scf.if %2 {
      %c0_40 = arith.constant 0 : index
      %c0_41 = arith.constant 0 : index
      %63 = vector.load %arg1[%c0_40, %c0_41] : memref<16x128xf32, #tpu.memory_space<vmem>>, vector<16x128xf32>
      %c0_42 = arith.constant 0 : index
      %c0_43 = arith.constant 0 : index
      %64 = vector.load %arg11[%c0_42, %c0_43] : memref<16x128xf32, #tpu.memory_space<vmem>>, vector<16x128xf32>
      tpu.vector_store %arg11[%c0_42, %c0_43], %63 {strides = array<i32>} : memref<16x128xf32, #tpu.memory_space<vmem>>, vector<16x128xf32>,
    } else {
    }
    %c0 = arith.constant 0 : index
    %c0_1 = arith.constant 0 : index
    %3 = vector.load %arg11[%c0, %c0_1] : memref<16x128xf32, #tpu.memory_space<vmem>>, vector<16x128xf32>
    %c0_2 = arith.constant 0 : index
    %c0_3 = arith.constant 0 : index
    %4 = vector.load %arg2[%c0_2, %c0_3] : memref<128x16xbf16, #tpu.memory_space<vmem>>, vector<128x16xbf16>
    %5 = arith.extf %4 : vector<128x16xbf16> to vector<128x16xf32>
    %c0_4 = arith.constant 0 : index
    %c0_5 = arith.constant 0 : index
    %6 = vector.load %arg3[%c0_4, %c0_5] : memref<16x128xbf16, #tpu.memory_space<vmem>>, vector<16x128xbf16>
    %7 = arith.extf %6 : vector<16x128xbf16> to vector<16x128xf32>
    %cst = arith.constant dense<0.000000e+00> : vector<128x128xf32>
    %8 = tpu.matmul %5, %3, %cst {dimension_numbers = #tpu.dot_dimension_numbers<[1], [0], [0], [1], [0, 0, 1, 1], [], []>} : vector<128x16xf32>, vector<16x128xf32>, vector<128x128xf32> -> vector<128x128xf32>
    %c0_6 = arith.constant 0 : index
    %c0_7 = arith.constant 0 : index
    %c0_8 = arith.constant 0 : index
    %9 = vector.load %arg4[%c0_6, %c0_7, %c0_8] : memref<1x128x128xf32, #tpu.memory_space<vmem>>, vector<1x128x128xf32>
    %10 = vector.shape_cast %9 : vector<1x128x128xf32> to vector<128x128xf32>
    %11 = arith.addf %8, %10 : vector<128x128xf32>
    %cst_9 = arith.constant dense<0.000000e+00> : vector<16x128xf32>
    %12 = tpu.matmul %7, %11, %cst_9 {dimension_numbers = #tpu.dot_dimension_numbers<[1], [0], [0], [1], [0, 0, 1, 1], [], []>} : vector<16x128xf32>, vector<128x128xf32>, vector<16x128xf32> -> vector<16x128xf32>
    %c0_10 = arith.constant 0 : index
    %c0_11 = arith.constant 0 : index
    %c0_12 = arith.constant 0 : index
    %13 = vector.load %arg5[%c0_10, %c0_11, %c0_12] : memref<1x128x128xf32, #tpu.memory_space<vmem>>, vector<1x128x128xf32>
    %14 = vector.shape_cast %13 : vector<1x128x128xf32> to vector<128x128xf32>
    %cst_13 = arith.constant dense<0.000000e+00> : vector<16x128xf32>
    %15 = tpu.matmul %12, %14, %cst_13 {dimension_numbers = #tpu.dot_dimension_numbers<[1], [0], [0], [1], [0, 0, 1, 1], [], []>} : vector<16x128xf32>, vector<128x128xf32>, vector<16x128xf32> -> vector<16x128xf32>
    %c0_14 = arith.constant 0 : index
    %c0_15 = arith.constant 0 : index
    %c0_16 = arith.constant 0 : index
    %16 = vector.load %arg6[%c0_14, %c0_15, %c0_16] : memref<1x1x128xf32, #tpu.memory_space<vmem>>, vector<1x1x128xf32>
    %17 = vector.shape_cast %16 : vector<1x1x128xf32> to vector<1x128xf32>
    %18 = vector.broadcast %17 : vector<1x128xf32> to vector<16x128xf32>
    %19 = arith.addf %15, %18 : vector<16x128xf32>
    %cst_17 = arith.constant 0.000000e+00 : f32
    %20 = vector.broadcast %cst_17 : f32 to vector<16x128xf32>
    %21 = arith.maximumf %19, %20 : vector<16x128xf32>
    %c0_18 = arith.constant 0 : index
    %c0_19 = arith.constant 0 : index
    %c0_20 = arith.constant 0 : index
    %22 = vector.load %arg7[%c0_18, %c0_19, %c0_20] : memref<1x128x128xf32, #tpu.memory_space<vmem>>, vector<1x128x128xf32>
    %23 = vector.shape_cast %22 : vector<1x128x128xf32> to vector<128x128xf32>
    %cst_21 = arith.constant dense<0.000000e+00> : vector<16x128xf32>
    %24 = tpu.matmul %21, %23, %cst_21 {dimension_numbers = #tpu.dot_dimension_numbers<[1], [0], [0], [1], [0, 0, 1, 1], [], []>} : vector<16x128xf32>, vector<128x128xf32>, vector<16x128xf32> -> vector<16x128xf32>
    %c0_22 = arith.constant 0 : index
    %c0_23 = arith.constant 0 : index
    %c0_24 = arith.constant 0 : index
    %25 = vector.load %arg8[%c0_22, %c0_23, %c0_24] : memref<1x1x128xf32, #tpu.memory_space<vmem>>, vector<1x1x128xf32>
    %26 = vector.shape_cast %25 : vector<1x1x128xf32> to vector<1x128xf32>
    %27 = vector.broadcast %26 : vector<1x128xf32> to vector<16x128xf32>
    %28 = arith.addf %24, %27 : vector<16x128xf32>
    %cst_25 = arith.constant dense<0.000000e+00> : vector<128xf32>
    %29 = vector.multi_reduction <add>, %28, %cst_25 [0] : vector<16x128xf32> to vector<128xf32>
    %30 = vector.shape_cast %29 : vector<128xf32> to vector<1x128xf32>
    %cst_26 = arith.constant 6.250000e-02 : f32
    %31 = vector.broadcast %cst_26 : f32 to vector<1x128xf32>
    %32 = arith.mulf %30, %31 : vector<1x128xf32>
    %33 = arith.mulf %28, %28 : vector<16x128xf32>
    %cst_27 = arith.constant dense<0.000000e+00> : vector<128xf32>
    %34 = vector.multi_reduction <add>, %33, %cst_27 [0] : vector<16x128xf32> to vector<128xf32>
    %35 = vector.shape_cast %34 : vector<128xf32> to vector<1x128xf32>
    %cst_28 = arith.constant 6.250000e-02 : f32
    %36 = vector.broadcast %cst_28 : f32 to vector<1x128xf32>
    %37 = arith.mulf %35, %36 : vector<1x128xf32>
    %38 = arith.mulf %32, %32 : vector<1x128xf32>
    %39 = arith.subf %37, %38 : vector<1x128xf32>
    %cst_29 = arith.constant 0.000000e+00 : f32
    %40 = vector.broadcast %cst_29 : f32 to vector<1x128xf32>
    %41 = arith.maximumf %39, %40 : vector<1x128xf32>
    %42 = vector.broadcast %32 : vector<1x128xf32> to vector<16x128xf32>
    %43 = arith.subf %28, %42 : vector<16x128xf32>
    %cst_30 = arith.constant 9.99999974E-6 : f32
    %44 = vector.broadcast %cst_30 : f32 to vector<1x128xf32>
    %45 = arith.addf %41, %44 : vector<1x128xf32>
    %46 = math.rsqrt %45 : vector<1x128xf32>
    %47 = vector.broadcast %46 : vector<1x128xf32> to vector<16x128xf32>
    %48 = arith.mulf %43, %47 : vector<16x128xf32>
    %c0_31 = arith.constant 0 : index
    %c0_32 = arith.constant 0 : index
    %c0_33 = arith.constant 0 : index
    %49 = vector.load %arg9[%c0_31, %c0_32, %c0_33] : memref<1x1x128xf32, #tpu.memory_space<vmem>>, vector<1x1x128xf32>
    %50 = vector.shape_cast %49 : vector<1x1x128xf32> to vector<1x128xf32>
    %51 = vector.broadcast %50 : vector<1x128xf32> to vector<16x128xf32>
    %52 = arith.mulf %48, %51 : vector<16x128xf32>
    %c0_34 = arith.constant 0 : index
    %c0_35 = arith.constant 0 : index
    %c0_36 = arith.constant 0 : index
    %53 = vector.load %arg10[%c0_34, %c0_35, %c0_36] : memref<1x1x128xf32, #tpu.memory_space<vmem>>, vector<1x1x128xf32>
    %54 = vector.shape_cast %53 : vector<1x1x128xf32> to vector<1x128xf32>
    %55 = vector.broadcast %54 : vector<1x128xf32> to vector<16x128xf32>
    %56 = arith.addf %52, %55 : vector<16x128xf32>
    %c2_i32 = arith.constant 2 : i32
    %57 = arith.cmpi ne, %arg0, %c2_i32 : i32
    %58 = arith.extui %57 : i1 to i32
    %c0_i32_37 = arith.constant 0 : i32
    %59 = arith.cmpi ne, %58, %c0_i32_37 : i32
    scf.if %59 {
      %cst_40 = arith.constant 0.000000e+00 : f32
      %63 = vector.broadcast %cst_40 : f32 to vector<16x128xf32>
      %64 = arith.maximumf %56, %63 : vector<16x128xf32>
      %c0_41 = arith.constant 0 : index
      %c0_42 = arith.constant 0 : index
      %65 = vector.load %arg11[%c0_41, %c0_42] : memref<16x128xf32, #tpu.memory_space<vmem>>, vector<16x128xf32>
      tpu.vector_store %arg11[%c0_41, %c0_42], %64 {strides = array<i32>} : memref<16x128xf32, #tpu.memory_space<vmem>>, vector<16x128xf32>,
    } else {
    }
    %c2_i32_38 = arith.constant 2 : i32
    %60 = arith.cmpi eq, %arg0, %c2_i32_38 : i32
    %61 = arith.extui %60 : i1 to i32
    %c0_i32_39 = arith.constant 0 : i32
    %62 = arith.cmpi ne, %61, %c0_i32_39 : i32
    scf.if %62 {
      %c0_40 = arith.constant 0 : index
      %c0_41 = arith.constant 0 : index
      %63 = vector.load %arg11[%c0_40, %c0_41] : memref<16x128xf32, #tpu.memory_space<vmem>>, vector<16x128xf32>
      tpu.vector_store %arg11[%c0_40, %c0_41], %56 {strides = array<i32>} : memref<16x128xf32, #tpu.memory_space<vmem>>, vector<16x128xf32>,
    } else {
    }
    return
  }
  func.func @transform_0(%arg0: i32) -> (i32, i32) {
    %c0_i32 = arith.constant 0 : i32
    %c0_i32_0 = arith.constant 0 : i32
    %c0_i32_1 = arith.constant 0 : i32
    return %c0_i32, %c0_i32_0 : i32, i32
  }
  func.func @transform_1(%arg0: i32) -> (i32, i32) {
    %c0_i32 = arith.constant 0 : i32
    %c0_i32_0 = arith.constant 0 : i32
    %c0_i32_1 = arith.constant 0 : i32
    return %c0_i32, %c0_i32_0 : i32, i32
  }
  func.func @transform_2(%arg0: i32) -> (i32, i32) {
    %c0_i32 = arith.constant 0 : i32
    %c0_i32_0 = arith.constant 0 : i32
    %c0_i32_1 = arith.constant 0 : i32
    return %c0_i32, %c0_i32_0 : i32, i32
  }
  func.func @transform_3(%arg0: i32) -> (i32, i32, i32) {
    %c0_i32 = arith.constant 0 : i32
    %c0_i32_0 = arith.constant 0 : i32
    %c0_i32_1 = arith.constant 0 : i32
    return %arg0, %c0_i32, %c0_i32_0 : i32, i32, i32
  }
  func.func @transform_4(%arg0: i32) -> (i32, i32, i32) {
    %c0_i32 = arith.constant 0 : i32
    %c0_i32_0 = arith.constant 0 : i32
    %c0_i32_1 = arith.constant 0 : i32
    return %arg0, %c0_i32, %c0_i32_0 : i32, i32, i32
  }
  func.func @transform_5(%arg0: i32) -> (i32, i32, i32) {
    %c0_i32 = arith.constant 0 : i32
    %c0_i32_0 = arith.constant 0 : i32
    %c0_i32_1 = arith.constant 0 : i32
    return %arg0, %c0_i32, %c0_i32_0 : i32, i32, i32
  }
  func.func @transform_6(%arg0: i32) -> (i32, i32, i32) {
    %c0_i32 = arith.constant 0 : i32
    %c0_i32_0 = arith.constant 0 : i32
    %c0_i32_1 = arith.constant 0 : i32
    return %arg0, %c0_i32, %c0_i32_0 : i32, i32, i32
  }
  func.func @transform_7(%arg0: i32) -> (i32, i32, i32) {
    %c0_i32 = arith.constant 0 : i32
    %c0_i32_0 = arith.constant 0 : i32
    %c0_i32_1 = arith.constant 0 : i32
    return %arg0, %c0_i32, %c0_i32_0 : i32, i32, i32
  }
  func.func @transform_8(%arg0: i32) -> (i32, i32, i32) {
    %c0_i32 = arith.constant 0 : i32
    %c0_i32_0 = arith.constant 0 : i32
    %c0_i32_1 = arith.constant 0 : i32
    return %arg0, %c0_i32, %c0_i32_0 : i32, i32, i32
  }
  func.func @transform_9(%arg0: i32) -> (i32, i32, i32) {
    %c0_i32 = arith.constant 0 : i32
    %c0_i32_0 = arith.constant 0 : i32
    %c0_i32_1 = arith.constant 0 : i32
    return %arg0, %c0_i32, %c0_i32_0 : i32, i32, i32
  }
  func.func @transform_10(%arg0: i32) -> (i32, i32) {
    %c0_i32 = arith.constant 0 : i32
    %c0_i32_0 = arith.constant 0 : i32
    %c0_i32_1 = arith.constant 0 : i32
    return %c0_i32, %c0_i32_0 : i32, i32
  }
}

</mosaic_0001>

<bundles_post_ra>
// kernel: tpu_custom_call.1
= control target key start
LH: loop header
LB: loop body
LE: loop exit
PB: predicated region body
PF: predicated region fallthrough
CT: control target
= control target key end

     0   :  { %s2280_s0 = inlined_call_operand.vmem [shape: f32[16,128], index: 0, kind: input, shape index: {}]   ;;  %s2281_s1 = inlined_call_operand.vmem [shape: bf16[128,16], index: 1, kind: input, shape index: {}]   ;;  %s2282_s2 = inlined_call_operand.vmem [shape: bf16[16,128], index: 2, kind: input, shape index: {}]   ;;  %s2283_s3 = inlined_call_operand.hbm [shape: f32[3,128,128], index: 3, kind: input, shape index: {}]   ;;  %s2284_s4 = inlined_call_operand.hbm [shape: f32[3,128,128], index: 4, kind: input, shape index: {}]   ;;  %s2285_s5 = inlined_call_operand.vmem [shape: f32[3,1,128], index: 5, kind: input, shape index: {}]   ;;  %s2286_s6 = inlined_call_operand.hbm [shape: f32[3,128,128], index: 6, kind: input, shape index: {}]   ;;  %s2287_s7 = inlined_call_operand.vmem [shape: f32[3,1,128], index: 7, kind: input, shape index: {}]   ;;  %s2288_s8 = inlined_call_operand.vmem [shape: f32[3,1,128], index: 8, kind: input, shape index: {}]   ;;  %s2289_s9 = inlined_call_operand.vmem [shape: f32[3,1,128], index: 9, kind: input, shape index: {}]   ;;  %s2290_s10 = inlined_call_operand.hbm [shape: f32[16,128], index: 10, kind: output, shape index: {}]  }
   0x1   :  { %2300 = sst [smem:[#allocation14_spill]] %s2282_s2 }
   0x2   :  { %2301 = sst [smem:[#allocation15_spill]] %s2284_s4 }
   0x3   :  { %2302 = sst [smem:[#allocation16_spill]] %s2290_s10 }
   0x4   :  { %15 = vsyncpa [#allocation3], 0 }
   0x5   :  { %17 = vsyncpa [#allocation3 + $0x1], 0 }
   0x6   :  { %18 = vsyncpa [#allocation6], 0 }
   0x7   :  { %20 = vsyncpa [#allocation6 + $0x1], 0 }
   0x8   :  { %21 = vsyncpa [#allocation4], 0  ;;  %s1904_s13 = smov 0   ;;  %s1906_s14 = smov 0  }
   0x9   :  { %s1908_s15 = smov 0   ;;  %s1910_s16 = smov 0  }
   0xa LB: > { %s1923_s17 = sadd.s32 4294967295, %s1839_s16   ;;  %s1926_s18 = sadd.s32 1, %s1839_s16   ;;  %s1839_s16 = sphi %s1910_s16, %s2319_s16   ;;  %s1835_s15 = sphi %s1908_s15, %s2323_s15   ;;  %s1831_s14 = sphi %s1906_s14, %s2322_s14   ;;  %s1827_s13 = sphi %s1904_s13, %s2321_s13  }
   0xb   : > { %2303 = sst [smem:[#allocation12_spill]] %s1926_s18  ;;  %s94_s19 = ssub.s32 %s1839_s16, %s1926_s18 }
   0xc   : > { %s97_s20 = sadd.s32 1, %s1835_s15  ;;  %p95_p0 = scmp.eq.s32.totalorder %s94_s19, 0 }
   0xd   : > { %p104_p1 = scmp.ne.s32.totalorder %s1835_s15, %s1831_s14  ;;  %p105_p2 = scmp.eq.s32.totalorder %s1839_s16, 0 }
   0xe   : > { %p110_p3 = scmp.ne.s32.totalorder %s1831_s14, %s1827_s13  ;;  %p111_p5 = scmp.eq.s32.totalorder %s1923_s17, 0 }
   0xf   : > { %s1936_s21 = scalar_select %p95_p0, %s1835_s15, %s97_s20  }
  0x10   : > { %p106_p4 = por %p105_p2, %p104_p1  ;;  %p1639_p6 = scmp.lt.s32.totalorder %s1839_s16, 3 }
  0x11   : > { %2304 = sst [smem:[#allocation13_spill]] %s1936_s21  ;;  %p1940_p7 = por %p111_p5, %p110_p3 }
  0x12   : > { %s2291_s23 = sand.u32 1, %s1835_s15   ;;  %s1950_s25 = sshll.u32 %s1839_s16, 11 }
  0x13   : > { %s2305_s22 = scalar_select %p1940_p7, 1, 0 }
  0x14   : > { %s1947_s24 = sshll.u32 %s2291_s23, 7  ;;  %p1952_p8 = pnand %p1639_p6, %p106_p4 }
  0x15   : > { %s341_s27 = sand.u32 1, %s1839_s16   ;;  %s2307_s4 = sld [smem:[#allocation15_spill]] }
  0x16   : > { %s345_s11 = scalar_lea.vmem [#allocation5], %s1947_s24  ;;  %s1968_s13 = scalar_lea.sflag [#allocation6], %s341_s27 }
  0x17   : > { %s352_s12 = sshll.u32 %s345_s11, 4  ;;  %p1974_p12 = pneg %p1952_p8  ;;  %s1965_s12 = int_to_ptr.vmem [resolvable:$true] %s352_s12 }
  0x1b   : > { %s1961_s30 = scalar_lea.hbm %s2307_s4, %s1950_s25  ;;  %s1686_s11 = scalar_lea.hbm %s2307_s4, 6144 }
  0x1c   : > { %s1681_s19 = scalar_lea.hbm %s1961_s30, 2048  ;;  %p1687_p1 = scmp.lt.u32.totalorder %s1961_s30, %s2307_s4 }
  0x1d   : > { %p1682_p11 = scmp.ne.s32.totalorder %s1961_s30, %s1681_s19  ;;  %p1688_p2 = scmp.lt.u32.totalorder %s1686_s11, %s1681_s19 }
  0x1e   : > { %p1690_p4 = scmp.lt.u32.totalorder %s1681_s19, %s1961_s30 }
  0x1f   : > { %p1684_p13 = pnand %p1974_p12, %p1682_p11  ;;  %p1689_p3 = por %p1688_p2, %p1687_p1 }
  0x21   : > { %p1685_p0 = pneg %p1684_p13  ;;  %p1691_p5 = por %p1690_p4, %p1689_p3 }
  0x23   : > { %p1692_p6 = pnand %p1691_p5, %p1685_p0 }
  0x25   : > { %1695 = shalt.err (!%p1692_p6)
}
  0x26   : > { %s1696_s27 = scalar_lea.vmem %s1965_s12, 2048  ;;  %s1841_s28 = smov [#allocation5]  }
  0x27   : > { %p1697_p11 = scmp.ne.s32.totalorder %s1965_s12, %s1696_s27  ;;  %s1701_s29 = sshll.u32 %s1841_s28, 4  ;;  %s1702_s29 = int_to_ptr.vmem [resolvable:$false] %s1701_s29 }
  0x28   : > { %s1703_s21 = scalar_lea.vmem %s1702_s29, 4096  ;;  %p1704_p10 = scmp.lt.s32.totalorder %s1965_s12, %s1702_s29 }
  0x29   : > { %p1699_p13 = pnand %p1697_p11, %p1974_p12  ;;  %p1705_p7 = scmp.lt.s32.totalorder %s1703_s21, %s1696_s27 }
  0x2b   : > { %p1700_p9 = pneg %p1699_p13  ;;  %p1706_p1 = por %p1705_p7, %p1704_p10 }
  0x2d   : > { %p1707_p2 = pnand %p1706_p1, %p1700_p9 }
  0x2f   : > { %1710 = shalt.err (!%p1707_p2)
}
  0x30   : > { %s2293_s23 = smov 128   ;;  %s2295_s19 = smov 8  }
  0x31   : > { %1635 = dma.hbm_to_vmem [thread:$0]  (!%p1952_p8), %s1961_s30, 2048, %s1965_s12, %s1968_s13, %s2293_s23, %s2293_s23, %s2295_s19  }
  0x32   : > { %p2309_p7 = scmp.lt.s32.totalorder %s1839_s16, 4  ;;  %p2310_p9 = scmp.ge.s32.totalorder %s1839_s16, 1 }
  0x33   : > { %s2013_s29 = scalar_lea.hbm %s2283_s3, %s1950_s25  ;;  %s324_s21 = scalar_lea.vmem [#allocation2], %s1947_s24 }
  0x34   : > { %p2005_p10 = pnand %p2310_p9, %p2309_p7  ;;  %s331_s4 = sshll.u32 %s324_s21, 4  ;;  %s2016_s4 = int_to_ptr.vmem [resolvable:$true] %s331_s4 }
  0x35   : > { %s2022_s16 = scalar_lea.hbm %s2286_s6, %s1950_s25  ;;  %s2312_s23 = sand.u32 1, %s1835_s15  }
  0x36   : > { %s2311_s11 = scalar_select %p2005_p10, 1, 0 }
  0x37   : > { %s2026_s19 = scalar_lea.sflag [#allocation3], %s2312_s23  ;;  %s1711_s18 = scalar_lea.hbm %s2013_s29, 2048 }
  0x38   : > { %p1712_p0 = scmp.ne.s32.totalorder %s2013_s29, %s1711_s18  ;;  %s1716_s10 = scalar_lea.hbm %s2283_s3, 6144 }
  0x39   : > { %p1717_p5 = scmp.lt.u32.totalorder %s2013_s29, %s2283_s3  ;;  %p1718_p6 = scmp.lt.u32.totalorder %s1716_s10, %s1711_s18 }
  0x3a   : > { %p1714_p3 = pnand %p1712_p0, %p1974_p12  ;;  %p1720_p13 = scmp.lt.u32.totalorder %s1711_s18, %s2013_s29 }
  0x3b   : > { %p1719_p11 = por %p1718_p6, %p1717_p5 }
  0x3c   : > { %p1715_p4 = pneg %p1714_p3 }
  0x3d   : > { %p1721_p1 = por %p1720_p13, %p1719_p11 }
  0x3f   : > { %p1722_p2 = pnand %p1721_p1, %p1715_p4 }
  0x41   : > { %1725 = shalt.err (!%p1722_p2)
}
  0x42   : > { %s1726_s25 = scalar_lea.vmem %s2016_s4, 2048  ;;  %s1844_s23 = smov [#allocation2]  }
  0x43   : > { %p1727_p7 = scmp.ne.s32.totalorder %s2016_s4, %s1726_s25  ;;  %s1731_s30 = sshll.u32 %s1844_s23, 4  ;;  %s1732_s30 = int_to_ptr.vmem [resolvable:$false] %s1731_s30 }
  0x44   : > { %s1733_s2 = scalar_lea.vmem %s1732_s30, 4096  ;;  %p1734_p3 = scmp.lt.s32.totalorder %s2016_s4, %s1732_s30 }
  0x45   : > { %p1729_p9 = pnand %p1727_p7, %p1974_p12  ;;  %p1735_p10 = scmp.lt.s32.totalorder %s1733_s2, %s1726_s25 }
  0x47   : > { %p1730_p0 = pneg %p1729_p9  ;;  %p1736_p5 = por %p1735_p10, %p1734_p3 }
  0x49   : > { %p1737_p6 = pnand %p1736_p5, %p1730_p0 }
  0x4b   : > { %1740 = shalt.err (!%p1737_p6)
}
  0x4c   : > { %s2313_s10 = smov 8   ;;  %s2314_s18 = smov 128  }
  0x4d   : > { %1632 = dma.hbm_to_vmem [thread:$0]  (!%p1952_p8), %s2013_s29, 2048, %s2016_s4, %s2026_s19, %s2314_s18, %s2314_s18, %s2313_s10  }
  0x4e   : > { %s372_s12 = scalar_lea.vmem [#allocation7], %s1947_s24  ;;  %s1741_s28 = scalar_lea.hbm %s2022_s16, 2048 }
  0x4f   : > { %s379_s27 = sshll.u32 %s372_s12, 4  ;;  %p1742_p10 = scmp.ne.s32.totalorder %s2022_s16, %s1741_s28  ;;  %s2054_s27 = int_to_ptr.vmem [resolvable:$true] %s379_s27 }
  0x50   : > { %s1746_s23 = scalar_lea.hbm %s2286_s6, 6144  ;;  %p1747_p13 = scmp.lt.u32.totalorder %s2022_s16, %s2286_s6 }
  0x51   : > { %p1744_p4 = pnand %p1742_p10, %p1974_p12  ;;  %p1748_p1 = scmp.lt.u32.totalorder %s1746_s23, %s1741_s28 }
  0x52   : > { %p1750_p7 = scmp.lt.u32.totalorder %s1741_s28, %s2022_s16 }
  0x53   : > { %p1745_p11 = pneg %p1744_p4  ;;  %p1749_p2 = por %p1748_p1, %p1747_p13 }
  0x55   : > { %p1751_p9 = por %p1750_p7, %p1749_p2 }
  0x57   : > { %p1752_p0 = pnand %p1751_p9, %p1745_p11 }
  0x59   : > { %1755 = shalt.err (!%p1752_p0)
}
  0x5a   : > { %s1756_s4 = scalar_lea.vmem %s2054_s27, 2048  ;;  %s1845_s24 = smov [#allocation7]  }
  0x5b   : > { %p1757_p3 = scmp.ne.s32.totalorder %s2054_s27, %s1756_s4  ;;  %s1761_s19 = sshll.u32 %s1845_s24, 4  ;;  %s1762_s19 = int_to_ptr.vmem [resolvable:$false] %s1761_s19 }
  0x5c   : > { %s1763_s29 = scalar_lea.vmem %s1762_s19, 4096  ;;  %p1764_p10 = scmp.lt.s32.totalorder %s2054_s27, %s1762_s19 }
  0x5d   : > { %p1759_p5 = pnand %p1757_p3, %p1974_p12  ;;  %p1765_p4 = scmp.lt.s32.totalorder %s1763_s29, %s1756_s4 }
  0x5f   : > { %p1760_p6 = pneg %p1759_p5  ;;  %p1766_p13 = por %p1765_p4, %p1764_p10 }
  0x61   : > { %p1767_p1 = pnand %p1766_p13, %p1760_p6 }
  0x63   : > { %1770 = shalt.err (!%p1767_p1)
}
  0x64   : > { %1638 = dma.hbm_to_vmem [thread:$0]  (!%p1952_p8), %s2022_s16, 2048, %s2054_s27, %s1968_s13, %s2314_s18, %s2314_s18, %s2313_s10  }
  0x65   : > { %p2315_p12 = scmp.ne.s32.totalorder %s2311_s11, 0 }
  0x66   : > { %s411_s20 = sand.u32 (!%p2315_p12), 1, %s1831_s14   ;;  %p2316_p11 = scmp.ne.s32.totalorder (!%p2315_p12), %s2305_s22, 0 }
  0x67   : > { %409 = sbr.rel (%p2315_p12) target bundleno = 1113 (0x459), region = 60  ;;  %s1238_s12 = sshll.u32 (!%p2315_p12), %s411_s20, 7 }
  0x68   : > { %s412_s28 = scalar_lea.sflag (!%p2315_p12), [#allocation3], %s411_s20  ;;  %s2084_s21 = scalar_lea.vmem (!%p2315_p12), [#allocation2], %s1238_s12 }
  0x6e   : > { %1814 = dma.done.wait (%p2316_p11), %s412_s28, 2048  }
  0x6f   : > { %1816 = vsyncadd (%p2316_p11), %s412_s28, 4294965248  ;;  %s420_s26 = sand.u32 1, %s1923_s17   ;;  %s2091_s13 = scalar_lea.vmem [#allocation5], %s1238_s12 }
  0x70   : > { %s421_s25 = scalar_lea.sflag [#allocation6], %s420_s26 }
  0x71   : > { %1818 = dma.done.wait (%p2316_p11), %s421_s25, 4096  }
  0x72   : > { %1820 = vsyncadd (%p2316_p11), %s421_s25, 4294963200  ;;  %p487_p8 = scmp.lt.s32.totalorder %s1923_s17, 2  ;;  %s2117_s20 = scalar_lea.vmem [#allocation7], %s1238_s12 }
  0x73   : > { %p1241_p2 = scmp.ne.s32.totalorder %s1923_s17, 0 }
  0x74   : > { %s2099_s11 = scalar_select %p487_p8, %s1923_s17, 2 }
  0x75   : > { %502 = sbr.rel (%p1241_p2) target bundleno = 124 (0x7c), region = 76  ;;  %v503_v0 = vld [vmem:[%s2280_s0] sm:$0xff] (!%p1241_p2)  ;;  %v504_v1 = vld [vmem:[%s2280_s0 + $0x8] sm:$0xff] (!%p1241_p2) }
  0x76   : > { %s489_s18 = scalar_lea.vmem %s2285_s5, %s2099_s11  ;;  %s492_s30 = scalar_lea.vmem %s2287_s7, %s2099_s11  ;;  %505 = vst [vmem:[#allocation8] sm:$0xff] (!%p1241_p2), %v503_v0  ;;  %506 = vst [vmem:[#allocation8 + $0x8] sm:$0xff] (!%p1241_p2), %v504_v1 }
  0x77   : > { %s495_s4 = scalar_lea.vmem %s2288_s8, %s2099_s11  ;;  %s498_s29 = scalar_lea.vmem %s2289_s9, %s2099_s11 }
  0x7c PF: > { %v1272_v4 = vld [vmem:[%s2281_s1] sm:$0xff]   ;;  %vm561_vm0 = vcmask 130048   ;;  %v1307_v7 = vld [vmem:[%s2281_s1 + $0x8] sm:$0xff]   ;;  %v1308_v10 = vld [vmem:[%s2281_s1 + $0x10] sm:$0xff]   ;;  %s2317_s24 = sld [smem:[#allocation14_spill]]  ;;  %p1262_p7 = scmp.eq.s32.totalorder %s1923_s17, 2 }
  0x7d   : > { %v507_v2 = vld [vmem:[#allocation8] sm:$0xff]  ;;  %v508_v3 = vld [vmem:[#allocation8 + $0x8] sm:$0xff]  ;;  %v1273_v6 = vunpack.c.l.bf16 %v1272_v4  ;;  %v1274_v8 = vunpack.c.h.bf16 %v1272_v4  ;;  %v1277_v9 = vunpack.c.l.bf16 %v1307_v7  ;;  %v1278_v11 = vunpack.c.h.bf16 %v1307_v7  ;;  %v1309_v13 = vld [vmem:[%s2281_s1 + $0x18] sm:$0xff]  }
  0x7e   : > { %v1519_v5 = vpack.c.bf16 %v508_v3, %v507_v2  ;;  %v1281_v12 = vunpack.c.l.bf16 %v1308_v10  ;;  %v1282_v14 = vunpack.c.h.bf16 %v1308_v10  ;;  %v1285_v15 = vunpack.c.l.bf16 %v1309_v13  ;;  %v1310_v16 = vld [vmem:[%s2281_s1 + $0x20] sm:$0xff]   ;;  %v1311_v19 = vld [vmem:[%s2281_s1 + $0x28] sm:$0xff]   ;;  %v1312_v22 = vld [vmem:[%s2281_s1 + $0x30] sm:$0xff]  }
  0x7f   : > { %1390 = vmatprep.mubr.msk.f32.mxu0 %vm561_vm0, %v1273_v6  ;;  %v1286_v17 = vunpack.c.h.bf16 %v1309_v13  ;;  %v1289_v18 = vunpack.c.l.bf16 %v1310_v16  ;;  %v1290_v20 = vunpack.c.h.bf16 %v1310_v16  ;;  %v1293_v21 = vunpack.c.l.bf16 %v1311_v19  ;;  %v1313_v25 = vld [vmem:[%s2281_s1 + $0x38] sm:$0xff]   ;;  %v830_v31 = vld [vmem:[%s2091_s13] sm:$0xff]  ;;  %v831_v32 = vld [vmem:[%s2091_s13 + $0x8] sm:$0xff] }
  0x80   : > { %1520 = vmatprep.subr.bf16.mxu0 %v1519_v5  ;;  %v1294_v23 = vunpack.c.h.bf16 %v1311_v19  ;;  %v1297_v24 = vunpack.c.l.bf16 %v1312_v22  ;;  %v1298_v26 = vunpack.c.h.bf16 %v1312_v22  ;;  %v1301_v27 = vunpack.c.l.bf16 %v1313_v25  ;;  %v832_v33 = vld [vmem:[%s2091_s13 + $0x10] sm:$0xff]  ;;  %v833_v35 = vld [vmem:[%s2091_s13 + $0x18] sm:$0xff]  ;;  %v834_v37 = vld [vmem:[%s2091_s13 + $0x20] sm:$0xff] }
  0x81   : > { %1522 = vmatpush3.bf16.msra.mxu0 %v1519_v5  ;;  %v1302_v28 = vunpack.c.h.bf16 %v1313_v25  ;;  %v1555_v34 = vpack.c.bf16 %v831_v32, %v830_v31  ;;  %v1559_v36 = vpack.c.bf16 %v833_v35, %v832_v33  ;;  %v835_v38 = vld [vmem:[%s2091_s13 + $0x28] sm:$0xff]  ;;  %v836_v40 = vld [vmem:[%s2091_s13 + $0x30] sm:$0xff]  ;;  %v837_v41 = vld [vmem:[%s2091_s13 + $0x38] sm:$0xff] }
  0x82   : > { %v2169_v29 = vld [vmem:[%s2317_s24] sm:$0xff]   ;;  %v1563_v39 = vpack.c.bf16 %v835_v38, %v834_v37  ;;  %v1567_v42 = vpack.c.bf16 %v837_v41, %v836_v40  ;;  %v839_v44 = vld [vmem:[%s2091_s13 + $0x48] sm:$0xff]  ;;  %v840_v46 = vld [vmem:[%s2091_s13 + $0x50] sm:$0xff] }
  0x83   : > { %v1305_v30 = vunpack.c.l.bf16 %v2169_v29  ;;  %1556 = vmatprep.subr.bf16.mxu0 %v1555_v34  ;;  %v838_v43 = vld [vmem:[%s2091_s13 + $0x40] sm:$0xff]  ;;  %v841_v47 = vld [vmem:[%s2091_s13 + $0x58] sm:$0xff]  ;;  %v843_v50 = vld [vmem:[%s2091_s13 + $0x68] sm:$0xff] }
  0x84   : > { %1391 = vmatmul.mubr.msk.f32.vlgmr.msra.gmra.mrb[0].mxu0 %vm561_vm0, %v1274_v8  ;;  %v1571_v45 = vpack.c.bf16 %v839_v44, %v838_v43  ;;  %v1575_v48 = vpack.c.bf16 %v841_v47, %v840_v46  ;;  %v842_v49 = vld [vmem:[%s2091_s13 + $0x60] sm:$0xff]  ;;  %v844_v52 = vld [vmem:[%s2091_s13 + $0x70] sm:$0xff]  ;;  %v845_v53 = vld [vmem:[%s2091_s13 + $0x78] sm:$0xff] }
  0x85   : > { %1393 = vmatprep.mubr.msk.f32.mxu0 %vm561_vm0, %v1277_v9  ;;  %1446 = vmatprep.mubr.f32.mxu1 %v1305_v30  ;;  %v1579_v51 = vpack.c.bf16 %v843_v50, %v842_v49  ;;  %v1583_v54 = vpack.c.bf16 %v845_v53, %v844_v52  ;;  %v546_v55 = vld [vmem:[%s2084_s21 + $0x8] sm:$0xff]  ;;  %v545_v56 = vld [vmem:[%s2084_s21] sm:$0xff]  ;;  %v548_v61 = vld [vmem:[%s2084_s21 + $0x18] sm:$0xff] }
  0x86   : > { %1558 = vmatpush3.bf16.msra.mxu0 %v1555_v34  ;;  %v547_v62 = vld [vmem:[%s2084_s21 + $0x10] sm:$0xff]  ;;  %v550_v4 = vld [vmem:[%s2084_s21 + $0x28] sm:$0xff]  ;;  %v549_v5 = vld [vmem:[%s2084_s21 + $0x20] sm:$0xff] }
  0x87   : > { %1560 = vmatprep.subr.bf16.mxu0 %v1559_v36  ;;  %v553_v19 = vld [vmem:[%s2084_s21 + $0x40] sm:$0xff]  ;;  %v556_v25 = vld [vmem:[%s2084_s21 + $0x58] sm:$0xff]  ;;  %v558_v33 = vld [vmem:[%s2084_s21 + $0x68] sm:$0xff] }
  0x88   : > { %1394 = vmatmul.mubr.msk.f32.gmra.mrb[2].mxu0 %vm561_vm0, %v1278_v11  ;;  %v552_v11 = vld [vmem:[%s2084_s21 + $0x38] sm:$0xff]  ;;  %v557_v34 = vld [vmem:[%s2084_s21 + $0x60] sm:$0xff]  ;;  %v559_v41 = vld [vmem:[%s2084_s21 + $0x70] sm:$0xff] }
  0x89   : > { %1396 = vmatprep.mubr.msk.f32.mxu0 %vm561_vm0, %v1281_v12  ;;  %v551_v12 = vld [vmem:[%s2084_s21 + $0x30] sm:$0xff]  ;;  %v560_v40 = vld [vmem:[%s2084_s21 + $0x78] sm:$0xff]  ;;  %v930_v49 = vld [vmem:[%s2117_s20] sm:$0xff] }
  0x8a   : > { %1562 = vmatpush3.bf16.msra.mxu0 %v1559_v36  ;;  %v931_v50 = vld [vmem:[%s2117_s20 + $0x8] sm:$0xff]  ;;  %v933_v53 = vld [vmem:[%s2117_s20 + $0x18] sm:$0xff] }
  0x8b   : > { %1564 = vmatprep.subr.bf16.mxu0 %v1563_v39  ;;  %v1587_v52 = vpack.c.bf16 %v931_v50, %v930_v49 }
  0x8c   : > { %1397 = vmatmul.mubr.msk.f32.gmra.mrb[4].mxu0 %vm561_vm0, %v1282_v14 }
  0x8d   : > { %1399 = vmatprep.mubr.msk.f32.mxu0 %vm561_vm0, %v1285_v15 }
  0x8e   : > { %1566 = vmatpush3.bf16.msra.mxu0 %v1563_v39 }
  0x8f   : > { %1568 = vmatprep.subr.bf16.mxu0 %v1567_v42 }
  0x90   : > { %1400 = vmatmul.mubr.msk.f32.gmra.mrb[6].mxu0 %vm561_vm0, %v1286_v17 }
  0x91   : > { %1402 = vmatprep.mubr.msk.f32.mxu0 %vm561_vm0, %v1289_v18  ;;  %v554_v18 = vld [vmem:[%s2084_s21 + $0x48] sm:$0xff] }
  0x92   : > { %1570 = vmatpush3.bf16.msra.mxu0 %v1567_v42 }
  0x93   : > { %1572 = vmatprep.subr.bf16.mxu0 %v1571_v45 }
  0x94   : > { %1403 = vmatmul.mubr.msk.f32.gmra.mrb[8].mxu0 %vm561_vm0, %v1290_v20 }
  0x95   : > { %1405 = vmatprep.mubr.msk.f32.mxu0 %vm561_vm0, %v1293_v21 }
  0x96   : > { %1574 = vmatpush3.bf16.msra.mxu0 %v1571_v45 }
  0x97   : > { %1576 = vmatprep.subr.bf16.mxu0 %v1575_v48 }
  0x98   : > { %1406 = vmatmul.mubr.msk.f32.gmra.mrb[10].mxu0 %vm561_vm0, %v1294_v23 }
  0x99   : > { %1408 = vmatprep.mubr.msk.f32.mxu0 %vm561_vm0, %v1297_v24 }
  0x9a   : > { %1578 = vmatpush3.bf16.msra.mxu0 %v1575_v48  ;;  %v1306_v48 = vunpack.c.h.bf16 %v2169_v29  ;;  %v936_v29 = vld [vmem:[%s2117_s20 + $0x30] sm:$0xff] }
  0x9b   : > { %1580 = vmatprep.subr.bf16.mxu0 %v1579_v51 }
  0x9c   : > { %1409 = vmatmul.mubr.msk.f32.gmra.mrb[12].mxu0 %vm561_vm0, %v1298_v26  ;;  %v555_v26 = vld [vmem:[%s2084_s21 + $0x50] sm:$0xff] }
  0x9d   : > { %1411 = vmatprep.mubr.msk.f32.mxu0 %vm561_vm0, %v1301_v27 }
  0x9e   : > { %1582 = vmatpush3.bf16.msra.mxu0 %v1579_v51  ;;  %v932_v51 = vld [vmem:[%s2117_s20 + $0x10] sm:$0xff] }
  0x9f   : > { %1584 = vmatprep.subr.bf16.mxu0 %v1583_v54 }
  0xa0   : > { %1412 = vmatmul.mubr.msk.f32.gmra.mrb[14].mxu0 %vm561_vm0, %v1302_v28 }
  0xa2   : > { %1586 = vmatpush3.bf16.msra.mxu0 %v1583_v54  ;;  %v1591_v54 = vpack.c.bf16 %v933_v53, %v932_v51  ;;  %v1261_v51 = vld [vmem:[%s498_s29] ss:$0 sm:$0xff] }
 0x157   : > { %v1392_v57 = vpop.f32.mrb[0].mxu0 }
 0x158   : > { %v682_v58 = vadd.f32 %v1392_v57, %v546_v55  ;;  %v676_v59 = vpop.f32.mrb[1].mxu0  ;;  %v934_v55 = vld [vmem:[%s2117_s20 + $0x20] sm:$0xff] }
 0x159   : > { %v677_v60 = vadd.f32 %v676_v59, %v545_v56  ;;  %v935_v56 = vld [vmem:[%s2117_s20 + $0x28] sm:$0xff] }
 0x15a   : > { %v1595_v57 = vpack.c.bf16 %v935_v56, %v934_v55 }
 0x15b   : > { %v1395_v63 = vpop.f32.mrb[2].mxu0  ;;  %v1523_v0 = vpack.c.bf16 %v682_v58, %v677_v60  ;;  %v937_v58 = vld [vmem:[%s2117_s20 + $0x38] sm:$0xff]  ;;  %v938_v60 = vld [vmem:[%s2117_s20 + $0x40] sm:$0xff] }
 0x15c   : > { %v692_v1 = vadd.f32 %v1395_v63, %v548_v61  ;;  %v686_v2 = vpop.f32.mrb[3].mxu0  ;;  %v1599_v59 = vpack.c.bf16 %v937_v58, %v936_v29  ;;  %v939_v61 = vld [vmem:[%s2117_s20 + $0x48] sm:$0xff]  ;;  %v940_v63 = vld [vmem:[%s2117_s20 + $0x50] sm:$0xff] }
 0x15d   : > { %v687_v3 = vadd.f32 %v686_v2, %v547_v62  ;;  %1524 = vmatprep.subr.bf16.mxu1 %v1523_v0  ;;  %v1603_v62 = vpack.c.bf16 %v939_v61, %v938_v60  ;;  %v942_v2 = vld [vmem:[%s2117_s20 + $0x60] sm:$0xff] }
 0x15e   : > { %1526 = vmatpush3.bf16.msra.mxu1 %v1523_v0  ;;  %v941_v0 = vld [vmem:[%s2117_s20 + $0x58] sm:$0xff] }
 0x15f   : > { %v1527_v6 = vpack.c.bf16 %v692_v1, %v687_v3  ;;  %v1398_v7 = vpop.f32.mrb[4].mxu0  ;;  %v1607_v1 = vpack.c.bf16 %v941_v0, %v940_v63  ;;  %v943_v3 = vld [vmem:[%s2117_s20 + $0x68] sm:$0xff] }
 0x160   : > { %v702_v8 = vadd.f32 %v1398_v7, %v550_v4  ;;  %v696_v9 = vpop.f32.mrb[5].mxu0  ;;  %v1611_v4 = vpack.c.bf16 %v943_v3, %v942_v2  ;;  %v944_v7 = vld [vmem:[%s2117_s20 + $0x70] sm:$0xff] }
 0x161   : > { %v697_v10 = vadd.f32 %v696_v9, %v549_v5  ;;  %1528 = vmatprep.subr.bf16.mxu1 %v1527_v6 }
 0x162   : > { %1530 = vmatpush3.bf16.msra.mxu1 %v1527_v6 }
 0x163   : > { %v1531_v13 = vpack.c.bf16 %v702_v8, %v697_v10  ;;  %v1401_v14 = vpop.f32.mrb[6].mxu0  ;;  %v945_v8 = vld [vmem:[%s2117_s20 + $0x78] sm:$0xff]  ;;  %v1258_v10 = vld [vmem:[%s489_s18] ss:$0 sm:$0xff] }
 0x164   : > { %v712_v15 = vadd.f32 %v1401_v14, %v552_v11  ;;  %v706_v16 = vpop.f32.mrb[7].mxu0  ;;  %v1615_v9 = vpack.c.bf16 %v945_v8, %v944_v7 }
 0x165   : > { %v707_v17 = vadd.f32 %v706_v16, %v551_v12  ;;  %1532 = vmatprep.subr.bf16.mxu1 %v1531_v13 }
 0x166   : > { %1534 = vmatpush3.bf16.msra.mxu1 %v1531_v13 }
 0x167   : > { %v1535_v20 = vpack.c.bf16 %v712_v15, %v707_v17  ;;  %v1404_v21 = vpop.f32.mrb[8].mxu0  ;;  %v1259_v17 = vld [vmem:[%s492_s30] ss:$0 sm:$0xff] }
 0x168   : > { %v722_v22 = vadd.f32 %v1404_v21, %v554_v18  ;;  %v716_v23 = vpop.f32.mrb[9].mxu0 }
 0x169   : > { %v717_v24 = vadd.f32 %v716_v23, %v553_v19  ;;  %1536 = vmatprep.subr.bf16.mxu1 %v1535_v20 }
 0x16a   : > { %1538 = vmatpush3.bf16.msra.mxu1 %v1535_v20 }
 0x16b   : > { %v1539_v27 = vpack.c.bf16 %v722_v22, %v717_v24  ;;  %v1407_v28 = vpop.f32.mrb[10].mxu0 }
 0x16c   : > { %v732_v30 = vadd.f32 %v1407_v28, %v556_v25  ;;  %v726_v31 = vpop.f32.mrb[11].mxu0 }
 0x16d   : > { %v727_v32 = vadd.f32 %v726_v31, %v555_v26  ;;  %1540 = vmatprep.subr.bf16.mxu1 %v1539_v27 }
 0x16e   : > { %1542 = vmatpush3.bf16.msra.mxu1 %v1539_v27 }
 0x16f   : > { %v1543_v35 = vpack.c.bf16 %v732_v30, %v727_v32  ;;  %v1410_v36 = vpop.f32.mrb[12].mxu0 }
 0x170   : > { %v742_v37 = vadd.f32 %v1410_v36, %v558_v33  ;;  %v736_v38 = vpop.f32.mrb[13].mxu0 }
 0x171   : > { %v737_v39 = vadd.f32 %v736_v38, %v557_v34  ;;  %1544 = vmatprep.subr.bf16.mxu1 %v1543_v35 }
 0x172   : > { %1546 = vmatpush3.bf16.msra.mxu1 %v1543_v35 }
 0x173   : > { %v1547_v42 = vpack.c.bf16 %v742_v37, %v737_v39  ;;  %v1413_v43 = vpop.f32.mrb[14].mxu0 }
 0x174   : > { %v752_v44 = vadd.f32 %v1413_v43, %v560_v40  ;;  %v746_v45 = vpop.f32.mrb[15].mxu0 }
 0x175   : > { %v747_v46 = vadd.f32 %v746_v45, %v559_v41  ;;  %1548 = vmatprep.subr.bf16.mxu1 %v1547_v42 }
 0x176   : > { %1550 = vmatpush3.bf16.msra.mxu1 %v1547_v42 }
 0x177   : > { %v1551_v47 = vpack.c.bf16 %v752_v44, %v747_v46 }
 0x179   : > { %1552 = vmatprep.subr.bf16.mxu1 %v1551_v47 }
 0x17a   : > { %1554 = vmatpush3.bf16.msra.mxu1 %v1551_v47 }
 0x17b   : > { %1588 = vmatprep.subr.bf16.mxu1 %v1587_v52 }
 0x17d   : > { %1447 = vmatmul.mubr.f32.vlgmr.msra.gmra.mrb[0].mxu1 %v1306_v48  ;;  %v1260_v48 = vld [vmem:[%s495_s4] ss:$0 sm:$0xff] }
 0x17e   : > { %1590 = vmatpush3.bf16.msra.mxu1 %v1587_v52 }
 0x17f   : > { %1592 = vmatprep.subr.bf16.mxu1 %v1591_v54 }
 0x182   : > { %1594 = vmatpush3.bf16.msra.mxu1 %v1591_v54 }
 0x183   : > { %1596 = vmatprep.subr.bf16.mxu1 %v1595_v57 }
 0x186   : > { %1598 = vmatpush3.bf16.msra.mxu1 %v1595_v57 }
 0x187   : > { %1600 = vmatprep.subr.bf16.mxu1 %v1599_v59 }
 0x18a   : > { %1602 = vmatpush3.bf16.msra.mxu1 %v1599_v59 }
 0x18b   : > { %1604 = vmatprep.subr.bf16.mxu1 %v1603_v62 }
 0x18e   : > { %1606 = vmatpush3.bf16.msra.mxu1 %v1603_v62 }
 0x18f   : > { %1608 = vmatprep.subr.bf16.mxu1 %v1607_v1 }
 0x192   : > { %1610 = vmatpush3.bf16.msra.mxu1 %v1607_v1 }
 0x193   : > { %1612 = vmatprep.subr.bf16.mxu1 %v1611_v4 }
 0x196   : > { %1614 = vmatpush3.bf16.msra.mxu1 %v1611_v4 }
 0x197   : > { %1616 = vmatprep.subr.bf16.mxu1 %v1615_v9 }
 0x19a   : > { %1618 = vmatpush3.bf16.msra.mxu1 %v1615_v9 }
 0x250   : > { %v1448_v5 = vpop.f32.mrb[0].mxu1 }
 0x251   : > { %v821_v6 = vpop.f32.mrb[1].mxu1 }
 0x252   : > { %1481 = vmatprep.mubr.f32.mxu0 %v821_v6 }
 0x253   : > { %1482 = vmatmul.mubr.f32.vlgmr.msra.gmra.mrb[16].mxu0 %v1448_v5 }
 0x326   : > { %v1483_v11 = vpop.f32.mrb[16].mxu0 }
 0x327   : > { %v925_v12 = vadd.f32 %v1483_v11, %v1258_v10  ;;  %v919_v13 = vpop.f32.mrb[17].mxu0 }
 0x328   : > { %v920_v14 = vadd.f32 %v1258_v10, %v919_v13 }
 0x329   : > { %v929_v16 = vmax.f32 %v925_v12, 0.0 }
 0x32a   : > { %v928_v15 = vmax.f32 %v920_v14, 0.0 }
 0x32c   : > { %1516 = vmatprep.mubr.f32.mxu1 %v928_v15 }
 0x32d   : > { %1517 = vmatmul.mubr.f32.vlgmr.msra.gmra.mrb[2].mxu1 %v929_v16 }
 0x400   : > { %v1518_v18 = vpop.f32.mrb[2].mxu1 }
 0x401   : > { %v1025_v19 = vadd.f32 %v1518_v18, %v1259_v17  ;;  %v1019_v20 = vpop.f32.mrb[3].mxu1 }
 0x402   : > { %v1020_v21 = vadd.f32 %v1259_v17, %v1019_v20 }
 0x403   : > { %v1037_v22 = vmul.f32 %v1025_v19, %v1025_v19 }
 0x404   : > { %v1028_v23 = vadd.f32 %v1025_v19, %v1020_v21  ;;  %v1036_v24 = vmul.f32 %v1020_v21, %v1020_v21 }
 0x406   : > { %v1029_v25 = vrot.slane %v1028_v23, 4  ;;  %v1038_v26 = vadd.f32 %v1037_v22, %v1036_v24 }
 0x408   : > { %v1030_v27 = vadd.f32 %v1029_v25, %v1028_v23  ;;  %v1039_v28 = vrot.slane %v1038_v26, 4 }
 0x40a   : > { %v1031_v30 = vrot.slane %v1030_v27, 2  ;;  %v1040_v31 = vadd.f32 %v1039_v28, %v1038_v26 }
 0x40c   : > { %v1032_v32 = vadd.f32 %v1031_v30, %v1030_v27  ;;  %v1041_v33 = vrot.slane %v1040_v31, 2 }
 0x40e   : > { %v1033_v34 = vrot.slane %v1032_v32, 1  ;;  %v1042_v35 = vadd.f32 %v1041_v33, %v1040_v31 }
 0x410   : > { %v1034_v36 = vadd.f32 %v1033_v34, %v1032_v32  ;;  %v1043_v37 = vrot.slane %v1042_v35, 1 }
 0x412   : > { %v1035_v38 = vmul.f32 0.0625, %v1034_v36  ;;  %v1044_v39 = vadd.f32 %v1043_v37, %v1042_v35 }
 0x414   : > { %v1045_v40 = vmul.f32 0.0625, %v1044_v39  ;;  %v1046_v41 = vmul.f32 %v1035_v38, %v1035_v38  ;;  %v1049_v42 = vsub.f32 %v1020_v21, %v1035_v38  ;;  %v1050_v43 = vsub.f32 %v1025_v19, %v1035_v38 }
 0x416   : > { %v1047_v44 = vsub.f32 %v1045_v40, %v1046_v41 }
 0x418   : > { %v1048_v45 = vmax.f32 %v1047_v44, 0.0 }
 0x41a   : > { %v1051_v46 = vadd.f32 1e-05, %v1048_v45 }
 0x41c   : > { %1679 = vrsqrt.f32 %v1051_v46 }
 0x425   : > { %1076 = sbr.rel (%p1262_p7) target bundleno = 1072 (0x430), region = 80 }
 0x426   : > { %v1680_v47 = vpop.eup %1679 }
 0x427   : > { %v1053_v49 = vmul.f32 %v1680_v47, %v1049_v42  ;;  %v1054_v50 = vmul.f32 %v1680_v47, %v1050_v43 }
 0x429   : > { %v1062_v52 = vmul.f32 %v1260_v48, %v1053_v49  ;;  %v1063_v53 = vmul.f32 %v1260_v48, %v1054_v50 }
 0x42b   : > { %v1071_v54 = vadd.f32 %v1261_v51, %v1062_v52  ;;  %v1072_v55 = vadd.f32 %v1261_v51, %v1063_v53 }
 0x42d   : > { %v1077_v56 = vmax.f32 %v1071_v54, 0.0  ;;  %v1078_v57 = vmax.f32 %v1072_v55, 0.0 }
 0x42f   : > { %1079 = vst [vmem:[#allocation8] sm:$0xff] %v1077_v56  ;;  %1080 = vst [vmem:[#allocation8 + $0x8] sm:$0xff] %v1078_v57 }
 0x430 PF: > { %p1263_p9 = scmp.ne.s32.totalorder %s1923_s17, 2 }
 0x431   : > { %1085 = vst [vmem:[#allocation8] sm:$0xff] (!%p1263_p9), %v1071_v54  ;;  %1086 = vst [vmem:[#allocation8 + $0x8] sm:$0xff] (!%p1263_p9), %v1072_v55 }
 0x432   : > { %1084 = sbr.rel (%p1263_p9) target bundleno = 1081 (0x439), region = 84 }
 0x439 PF: > { %s1846_s11 = smov [#allocation8]  }
 0x43a   : > { %s1093_s4 = sshll.u32 %s1846_s11, 4  ;;  %s1094_s4 = int_to_ptr.vmem [resolvable:$true] %s1093_s4 }
 0x43b   : > { %s1771_s29 = scalar_lea.vmem %s1094_s4, 256  ;;  %p1778_p6 = scmp.lt.s32.totalorder %s1094_s4, %s1094_s4 }
 0x43c   : > { %p1772_p0 = scmp.ne.s32.totalorder %s1094_s4, %s1771_s29  ;;  %p1779_p10 = scmp.lt.s32.totalorder %s1771_s29, %s1771_s29 }
 0x43e   : > { %p1773_p3 = pnand %p1772_p0, %p1262_p7  ;;  %p1780_p4 = por %p1779_p10, %p1778_p6 }
 0x440   : > { %p1774_p5 = pneg %p1773_p3 }
 0x442   : > { %p1781_p13 = pnand %p1780_p4, %p1774_p5 }
 0x444   : > { %1784 = shalt.err (!%p1781_p13)
}
 0x445   : > { %s2318_s10 = sld [smem:[#allocation16_spill]] }
 0x44b   : > { %s1785_s27 = scalar_lea.hbm %s2318_s10, 256 }
 0x44c   : > { %p1786_p1 = scmp.ne.s32.totalorder %s2318_s10, %s1785_s27  ;;  %p1791_p8 = scmp.lt.u32.totalorder %s1785_s27, %s2318_s10 }
 0x44e   : > { %p1787_p12 = pnand %p1786_p1, %p1262_p7 }
 0x450   : > { %p1788_p11 = pneg %p1787_p12 }
 0x452   : > { %p1793_p2 = pnand %p1791_p8, %p1788_p11 }
 0x454   : > { %1796 = shalt.err (!%p1793_p2)
}
 0x455   : > { %s1847_s24 = smov 128   ;;  %s1848_s21 = smov 8  }
 0x456   : > { %1626 = dma.vmem_to_hbm [thread:$0]  (%p1262_p7), %s1094_s4, 256, %s2318_s10, [#allocation4], %s1847_s24, %s1847_s24, %s1848_s21  }
 0x457   : > { %1822 = dma.done.wait (%p1262_p7), [#allocation4], 256  }
 0x458   : > { %1824 = vsyncadd (%p1262_p7), [#allocation4], 4294967040 }
 0x459 PF: > { %s2319_s16 = sld [smem:[#allocation12_spill]]  ;;  %s2320_s28 = sld [smem:[#allocation13_spill]] }
 0x45a   : > { %s2321_s13 = smov %s1831_s14  ;;  %s2322_s14 = smov %s1835_s15 }
 0x45f   : > { %p24_p9 = scmp.ge.s32.totalorder %s2319_s16, 5   ;;  %s2323_s15 = smov %s2320_s28 }
 0x461   :  { %26 = sbr.rel (!%p24_p9) target bundleno = 10 (0xa), region = 145 }
 0x468   :  { %1109 = vsyncpa [#allocation3], 1 }
 0x469   :  { %1111 = vsyncpa [#allocation3 + $0x1], 1 }
 0x46a   :  { %1112 = vsyncpa [#allocation6], 1 }
 0x46b   :  { %1114 = vsyncpa [#allocation6 + $0x1], 1 }
 0x46c   :  { %1115 = vsyncpa [#allocation4], 1 }
 0x46d   :  { %1117 = vsyncpa [#allocation4 + $0x1], 1 }

</bundles_post_ra>
